<compile_context>
chip_gen: v7x
topology: tpu7x:2x2x1
jax: 0.10.0
libtpu: 0.0.40
codegen_flags: <defaults>
</compile_context>

<pallas_src>
import jax
import jax.numpy as jnp
from jax import lax
from jax.experimental import pallas as pl
from jax.experimental.pallas import tpu as pltpu


# ----------------------------------------------------------------------------
# Static activation configuration (segment order along the feature axis).
# ----------------------------------------------------------------------------
SEGMENT_LEN = 8
NUM_SEGMENTS = 4                      # relu, sigmoid, tanh, softmax
TOTAL_FEATURES = SEGMENT_LEN * NUM_SEGMENTS          # 32
LANES = 128
ROWS_PER_GROUP = LANES // TOTAL_FEATURES             # 4 original rows / 128 lanes

_DEFAULT_ROW_TILE = 1024   # packed rows per block: 1024*128*4B = 512 KiB / buffer


# ----------------------------------------------------------------------------
# In-kernel helper: exact all-reduce over each aligned 8-lane block.
#
# Requirement: `v` holds the identity of `op` on every lane that is within 7
# lanes of a target block but does not belong to it.  Here the target
# (softmax) blocks start at lanes 24, 56, 88, 120 and are >= 24 lanes apart,
# and all non-softmax lanes are masked to the identity, so the requirement
# holds (including cyclic wrap-around).
#
# The +/-1, +/-3, +/-6 symmetric shifts compose to an exact centered window of
# 15 lanes (each element counted exactly once for `add`, idempotent for
# `max`), which always covers the whole 8-lane block of the current lane.
# Being symmetric, the result does not depend on the hardware roll direction
# convention.  Cost: 6 XLU rolls + 6 VPU combines per call.
# ----------------------------------------------------------------------------
def _blockwise_allreduce(v, op):
    def r(a, k):
        return pltpu.roll(a, k % LANES, axis=1)

    w1 = op(op(v, r(v, 1)), r(v, -1))        # window of 3, centered
    w2 = op(op(w1, r(w1, 3)), r(w1, -3))     # window of 9, centered
    w3 = op(op(w2, r(w1, 6)), r(w1, -6))     # window of 15, centered
    return w3


# ----------------------------------------------------------------------------
# Kernel body: one (TR, 128) lane-dense tile.
#   lane l  <->  original row  4*i + l // 32 ,  feature  l % 32
#   segment id = (l % 32) // 8 = (l >> 3) & 3 :  0 relu, 1 sigmoid, 2 tanh, 3 softmax
# ----------------------------------------------------------------------------
def _multi_activation_kernel(x_ref, o_ref):
    x = x_ref[...].astype(jnp.float32)                     # (TR, 128), f32 compute

    lane = lax.broadcasted_iota(jnp.int32, x.shape, 1)
    seg = (lane >> 3) & 3
    is_relu = seg == 0
    is_sig = seg == 1
    is_tanh = seg == 2
    is_soft = seg == 3

    # (1) Exact per-8-lane max for the softmax segments (numerical stability).
    m = _blockwise_allreduce(jnp.where(is_soft, x, -jnp.inf), jnp.maximum)
    shift = jnp.where(is_soft, m, 0.0)

    # (2) Single EUP exp pass shared by sigmoid / tanh / softmax.
    z = jnp.where(is_sig, -x,
        jnp.where(is_tanh, -2.0 * x,
        jnp.where(is_soft, x - shift, 0.0)))
    e = jnp.exp(z)

    # (3) Cheap per-lane finishes.
    relu_v = jnp.maximum(x, 0.0)
    inv1pe = 1.0 / (1.0 + e)          # = sigmoid(x) on sig lanes, (tanh(x)+1)/2 on tanh lanes
    sig_v = inv1pe
    tanh_v = 2.0 * inv1pe - 1.0

    # (4) Softmax: exact per-8-lane sum (XLU rolls) + EUP approximate
    #     reciprocal with one Newton step (restores ~f32 accuracy for ~2 VPU ops).
    denom = _blockwise_allreduce(jnp.where(is_soft, e, 0.0), jnp.add)
    denom = jnp.where(is_soft, denom, 1.0)                 # keep recip finite everywhere
    rcp = pl.reciprocal(denom, approx=True)
    rcp = rcp * (2.0 - denom * rcp)
    soft_v = e * rcp

    # (5) Combine in registers and do ONE lane-dense full-tile store.
    out = jnp.where(is_relu, relu_v,
          jnp.where(is_sig, sig_v,
          jnp.where(is_tanh, tanh_v, soft_v)))
    o_ref[...] = out.astype(o_ref.dtype)


# ----------------------------------------------------------------------------
# Wrapper: lane-dense packing, row tiling, pipelined pallas_call.
# ----------------------------------------------------------------------------
def multi_activation_head(x, *, row_tile=_DEFAULT_ROW_TILE):
    if x.shape[-1] != TOTAL_FEATURES:
        raise RuntimeError(
            f"Shape mismatch for the activations: expected {TOTAL_FEATURES}. "
            f"Got shape {x.shape}."
        )

    orig_shape = x.shape
    orig_dtype = x.dtype
    rows = 1
    for d in orig_shape[:-1]:
        rows *= d
    x2d = x.reshape(rows, TOTAL_FEATURES)

    # Lane-dense packing: 4 consecutive rows -> one 128-lane row (a free view
    # of the contiguous buffer).  Pad the row count so that (a) it is a
    # multiple of 4 for the packing reshape and (b) the packed row count is at
    # least 8 (a full (8,128) tile even for tiny inputs).  Padding is zeros,
    # so every activation stays finite; padded rows are cropped afterwards.
    padded_rows = max(pl.cdiv(rows, ROWS_PER_GROUP), 8) * ROWS_PER_GROUP
    if padded_rows != rows:
        x2d = jnp.pad(x2d, ((0, padded_rows - rows), (0, 0)))
    rp = padded_rows // ROWS_PER_GROUP
    xp = x2d.reshape(rp, LANES)

    # Row tile: biggest block that comfortably fits scoped VMEM on every chip
    # (v7x's 64 MiB included): 1024 x 128 x 4 B = 512 KiB per buffer; in+out
    # double-buffered ~ 2 MiB, so no vmem_limit_bytes override is needed and
    # default depth-2 buffering is kept (streaming kernel, bigger tiles beat
    # deeper buffering).  When rp % tr != 0 the last block is partial: Pallas
    # clips the out-of-bounds writeback, and every computation here is
    # row-independent, so garbage in the padded read region never reaches a
    # valid output row.
    tr = rp if rp <= row_tile else row_tile
    grid = (pl.cdiv(rp, tr),)

    out_p = pl.pallas_call(
        _multi_activation_kernel,
        out_shape=jax.ShapeDtypeStruct((rp, LANES), orig_dtype),
        grid=grid,
        in_specs=[pl.BlockSpec((tr, LANES), lambda i: (i, 0))],
        out_specs=pl.BlockSpec((tr, LANES), lambda i: (i, 0)),
        compiler_params=pltpu.CompilerParams(
            # Row tiles are independent -> shard across both TCs on v7x.
            dimension_semantics=("parallel",),
        ),
        # input_output_aliases={0: 0} could be added to drop the extra HBM
        # allocation when this head sits inside a memory-constrained graph.
    )(xp)

    out2d = out_p.reshape(padded_rows, TOTAL_FEATURES)[:rows]
    return out2d.reshape(orig_shape)


# ----------------------------------------------------------------------------
# Pure-JAX reference (mirrors the PyTorch module).
# ----------------------------------------------------------------------------
def _softmax_lastdim(v):
    m = jnp.max(v, axis=-1, keepdims=True)
    e = jnp.exp(v - m)
    return e / jnp.sum(e, axis=-1, keepdims=True)


_REF_ACTIVATIONS = (
    (lambda v: jnp.maximum(v, 0.0), SEGMENT_LEN),   # ReLU
    (jax.nn.sigmoid, SEGMENT_LEN),                  # Sigmoid
    (jnp.tanh, SEGMENT_LEN),                        # Tanh
    (_softmax_lastdim, SEGMENT_LEN),                # Softmax(dim=-1)
)


def multi_activation_head_ref(x):
    out = jnp.zeros_like(x)
    split = 0
    for act_fn, step in _REF_ACTIVATIONS:
        out = out.at[..., split:split + step].set(act_fn(x[..., split:split + step]))
        split += step
    return out


if __name__ == "__main__":
    key = jax.random.PRNGKey(0)
    k1, k2, k3 = jax.random.split(key, 3)

    # Tolerance note: the only approximate component is the EUP reciprocal in
    # the softmax denominator (plus one Newton step) and the single-exp
    # sigmoid/tanh identities; everything else is exact f32.
    ATOL = RTOL = 1e-4

    # Primary case, consistent with the module: (batch=2, seq=8, features=32).
    x1 = jax.random.normal(k1, (2, 8, TOTAL_FEATURES), dtype=jnp.float32)
    out1 = multi_activation_head(x1)
    jax.block_until_ready(out1)
    assert out1.shape == x1.shape
    assert jnp.allclose(out1, multi_activation_head_ref(x1), atol=ATOL, rtol=RTOL), \
        "mismatch vs reference (primary case)"

    # Multi-tile grid + partial last block + large-magnitude inputs
    # (stresses the in-kernel segmented max / softmax stability).
    x2 = 50.0 * jax.random.normal(k2, (6, 50, TOTAL_FEATURES), dtype=jnp.float32)
    out2 = multi_activation_head(x2, row_tile=16)
    jax.block_until_ready(out2)
    assert jnp.allclose(out2, multi_activation_head_ref(x2), atol=ATOL, rtol=RTOL), \
        "mismatch vs reference (tiled / partial-block case)"

    # Row count not divisible by the 4-row lane-packing factor (padding path).
    x3 = jax.random.normal(k3, (3, 7, TOTAL_FEATURES), dtype=jnp.float32)
    out3 = multi_activation_head(x3)
    jax.block_until_ready(out3)
    assert jnp.allclose(out3, multi_activation_head_ref(x3), atol=ATOL, rtol=RTOL), \
        "mismatch vs reference (padding case)"

    print("KERNEL_OK")
</pallas_src>

<mosaic_0001>
module attributes {stable_mosaic.version = 11 : i64} {
  func.func @_multi_activation_kernel(%arg0: i32, %arg1: memref<8x128xf32, #tpu.memory_space<vmem>>, %arg2: memref<8x128xf32, #tpu.memory_space<vmem>>) attributes {dimension_semantics = [#tpu.dimension_semantics<parallel>], iteration_bounds = array<i64: 1>, scalar_prefetch = 0 : i64, scratch_operands = 0 : i64, tpu.core_type = #tpu.core_type<tc>, window_params = [{transform_indices = @transform_0, window_bounds = array<i64: 8, 128>}, {transform_indices = @transform_1, window_bounds = array<i64: 8, 128>}]} {
    %c0 = arith.constant 0 : index
    %c0_0 = arith.constant 0 : index
    %0 = vector.load %arg1[%c0, %c0_0] : memref<8x128xf32, #tpu.memory_space<vmem>>, vector<8x128xf32>
    %1 = tpu.iota {dimensions = array<i32: 1>} : vector<8x128xi32>
    %c3_i32 = arith.constant 3 : i32
    %2 = vector.broadcast %c3_i32 : i32 to vector<8x128xi32>
    %3 = arith.shrsi %1, %2 : vector<8x128xi32>
    %c3_i32_1 = arith.constant 3 : i32
    %4 = vector.broadcast %c3_i32_1 : i32 to vector<8x128xi32>
    %5 = arith.andi %3, %4 : vector<8x128xi32>
    %c0_i32 = arith.constant 0 : i32
    %6 = vector.broadcast %c0_i32 : i32 to vector<8x128xi32>
    %7 = arith.cmpi eq, %5, %6 : vector<8x128xi32>
    %c1_i32 = arith.constant 1 : i32
    %8 = vector.broadcast %c1_i32 : i32 to vector<8x128xi32>
    %9 = arith.cmpi eq, %5, %8 : vector<8x128xi32>
    %c2_i32 = arith.constant 2 : i32
    %10 = vector.broadcast %c2_i32 : i32 to vector<8x128xi32>
    %11 = arith.cmpi eq, %5, %10 : vector<8x128xi32>
    %c3_i32_2 = arith.constant 3 : i32
    %12 = vector.broadcast %c3_i32_2 : i32 to vector<8x128xi32>
    %13 = arith.cmpi eq, %5, %12 : vector<8x128xi32>
    %cst = arith.constant 0xFF800000 : f32
    %14 = vector.broadcast %cst : f32 to vector<8x128xf32>
    %15 = arith.select %13, %0, %14 : vector<8x128xi1>, vector<8x128xf32>
    %c1_i32_3 = arith.constant 1 : i32
    %16 = tpu.dynamic_rotate %15 by %c1_i32_3 dim 1 : vector<8x128xf32>, i32 -> vector<8x128xf32>
    %17 = arith.maximumf %15, %16 : vector<8x128xf32>
    %c127_i32 = arith.constant 127 : i32
    %18 = tpu.dynamic_rotate %15 by %c127_i32 dim 1 : vector<8x128xf32>, i32 -> vector<8x128xf32>
    %19 = arith.maximumf %17, %18 : vector<8x128xf32>
    %c3_i32_4 = arith.constant 3 : i32
    %20 = tpu.dynamic_rotate %19 by %c3_i32_4 dim 1 : vector<8x128xf32>, i32 -> vector<8x128xf32>
    %21 = arith.maximumf %19, %20 : vector<8x128xf32>
    %c125_i32 = arith.constant 125 : i32
    %22 = tpu.dynamic_rotate %19 by %c125_i32 dim 1 : vector<8x128xf32>, i32 -> vector<8x128xf32>
    %23 = arith.maximumf %21, %22 : vector<8x128xf32>
    %c6_i32 = arith.constant 6 : i32
    %24 = tpu.dynamic_rotate %19 by %c6_i32 dim 1 : vector<8x128xf32>, i32 -> vector<8x128xf32>
    %25 = arith.maximumf %23, %24 : vector<8x128xf32>
    %c122_i32 = arith.constant 122 : i32
    %26 = tpu.dynamic_rotate %19 by %c122_i32 dim 1 : vector<8x128xf32>, i32 -> vector<8x128xf32>
    %27 = arith.maximumf %25, %26 : vector<8x128xf32>
    %cst_5 = arith.constant 0.000000e+00 : f32
    %28 = vector.broadcast %cst_5 : f32 to vector<8x128xf32>
    %29 = arith.select %13, %27, %28 : vector<8x128xi1>, vector<8x128xf32>
    %cst_6 = arith.constant 0.000000e+00 : f32
    %30 = vector.broadcast %cst_6 : f32 to vector<8x128xf32>
    %31 = arith.subf %30, %0 : vector<8x128xf32>
    %cst_7 = arith.constant -2.000000e+00 : f32
    %32 = vector.broadcast %cst_7 : f32 to vector<8x128xf32>
    %33 = arith.mulf %32, %0 : vector<8x128xf32>
    %34 = arith.subf %0, %29 : vector<8x128xf32>
    %cst_8 = arith.constant 0.000000e+00 : f32
    %35 = vector.broadcast %cst_8 : f32 to vector<8x128xf32>
    %36 = arith.select %13, %34, %35 : vector<8x128xi1>, vector<8x128xf32>
    %37 = arith.select %11, %33, %36 : vector<8x128xi1>, vector<8x128xf32>
    %38 = arith.select %9, %31, %37 : vector<8x128xi1>, vector<8x128xf32>
    %39 = math.exp %38 : vector<8x128xf32>
    %cst_9 = arith.constant 0.000000e+00 : f32
    %40 = vector.broadcast %cst_9 : f32 to vector<8x128xf32>
    %41 = arith.maximumf %0, %40 : vector<8x128xf32>
    %cst_10 = arith.constant 1.000000e+00 : f32
    %42 = vector.broadcast %cst_10 : f32 to vector<8x128xf32>
    %43 = arith.addf %42, %39 : vector<8x128xf32>
    %cst_11 = arith.constant 1.000000e+00 : f32
    %44 = vector.broadcast %cst_11 : f32 to vector<8x128xf32>
    %45 = arith.divf %44, %43 : vector<8x128xf32>
    %cst_12 = arith.constant 2.000000e+00 : f32
    %46 = vector.broadcast %cst_12 : f32 to vector<8x128xf32>
    %47 = arith.mulf %46, %45 : vector<8x128xf32>
    %cst_13 = arith.constant 1.000000e+00 : f32
    %48 = vector.broadcast %cst_13 : f32 to vector<8x128xf32>
    %49 = arith.subf %47, %48 : vector<8x128xf32>
    %cst_14 = arith.constant 0.000000e+00 : f32
    %50 = vector.broadcast %cst_14 : f32 to vector<8x128xf32>
    %51 = arith.select %13, %39, %50 : vector<8x128xi1>, vector<8x128xf32>
    %c1_i32_15 = arith.constant 1 : i32
    %52 = tpu.dynamic_rotate %51 by %c1_i32_15 dim 1 : vector<8x128xf32>, i32 -> vector<8x128xf32>
    %53 = arith.addf %51, %52 : vector<8x128xf32>
    %c127_i32_16 = arith.constant 127 : i32
    %54 = tpu.dynamic_rotate %51 by %c127_i32_16 dim 1 : vector<8x128xf32>, i32 -> vector<8x128xf32>
    %55 = arith.addf %53, %54 : vector<8x128xf32>
    %c3_i32_17 = arith.constant 3 : i32
    %56 = tpu.dynamic_rotate %55 by %c3_i32_17 dim 1 : vector<8x128xf32>, i32 -> vector<8x128xf32>
    %57 = arith.addf %55, %56 : vector<8x128xf32>
    %c125_i32_18 = arith.constant 125 : i32
    %58 = tpu.dynamic_rotate %55 by %c125_i32_18 dim 1 : vector<8x128xf32>, i32 -> vector<8x128xf32>
    %59 = arith.addf %57, %58 : vector<8x128xf32>
    %c6_i32_19 = arith.constant 6 : i32
    %60 = tpu.dynamic_rotate %55 by %c6_i32_19 dim 1 : vector<8x128xf32>, i32 -> vector<8x128xf32>
    %61 = arith.addf %59, %60 : vector<8x128xf32>
    %c122_i32_20 = arith.constant 122 : i32
    %62 = tpu.dynamic_rotate %55 by %c122_i32_20 dim 1 : vector<8x128xf32>, i32 -> vector<8x128xf32>
    %63 = arith.addf %61, %62 : vector<8x128xf32>
    %cst_21 = arith.constant 1.000000e+00 : f32
    %64 = vector.broadcast %cst_21 : f32 to vector<8x128xf32>
    %65 = arith.select %13, %63, %64 : vector<8x128xi1>, vector<8x128xf32>
    %66 = tpu.reciprocal %65 {approx = true} : vector<8x128xf32> -> vector<8x128xf32>
    %67 = arith.mulf %65, %66 : vector<8x128xf32>
    %cst_22 = arith.constant 2.000000e+00 : f32
    %68 = vector.broadcast %cst_22 : f32 to vector<8x128xf32>
    %69 = arith.subf %68, %67 : vector<8x128xf32>
    %70 = arith.mulf %66, %69 : vector<8x128xf32>
    %71 = arith.mulf %39, %70 : vector<8x128xf32>
    %72 = arith.select %11, %49, %71 : vector<8x128xi1>, vector<8x128xf32>
    %73 = arith.select %9, %45, %72 : vector<8x128xi1>, vector<8x128xf32>
    %74 = arith.select %7, %41, %73 : vector<8x128xi1>, vector<8x128xf32>
    %c0_23 = arith.constant 0 : index
    %c0_24 = arith.constant 0 : index
    %75 = vector.load %arg2[%c0_23, %c0_24] : memref<8x128xf32, #tpu.memory_space<vmem>>, vector<8x128xf32>
    tpu.vector_store %arg2[%c0_23, %c0_24], %74 {strides = array<i32>} : memref<8x128xf32, #tpu.memory_space<vmem>>, vector<8x128xf32>,
    return
  }
  func.func @transform_0(%arg0: i32) -> (i32, i32) {
    %c0_i32 = arith.constant 0 : i32
    %c0_i32_0 = arith.constant 0 : i32
    return %arg0, %c0_i32 : i32, i32
  }
  func.func @transform_1(%arg0: i32) -> (i32, i32) {
    %c0_i32 = arith.constant 0 : i32
    %c0_i32_0 = arith.constant 0 : i32
    return %arg0, %c0_i32 : i32, i32
  }
}

</mosaic_0001>

<bundles_post_ra>
// kernel: tpu_custom_call.1
= control target key start
LH: loop header
LB: loop body
LE: loop exit
PB: predicated region body
PF: predicated region fallthrough
CT: control target
= control target key end

     0   :  { %6 = vsyncpa [#allocation3], 0  ;;  %s256_s0 = inlined_call_operand.hbm [shape: f32[8,128], index: 0, kind: input, shape index: {}]   ;;  %s257_s1 = inlined_call_operand.hbm [shape: f32[8,128], index: 1, kind: output, shape index: {}]  }
   0x1   :  { %7 = vsyncpa [#allocation4], 0  ;;  %s171_s6 = smov [#allocation2]   ;;  %s123_s10 = scalar_lea.hbm %s256_s0, 128 }
   0x2   :  { %s14_s7 = sshll.u32 %s171_s6, 4  ;;  %p124_p0 = scmp.ne.s32.totalorder %s256_s0, %s123_s10  ;;  %s15_s7 = int_to_ptr.vmem [resolvable:$true] %s14_s7 }
   0x3   :  { %p127_p1 = scmp.lt.u32.totalorder %s123_s10, %s256_s0 }
   0x5   :  { %p129_p2 = pnand %p127_p1, %p124_p0 }
   0x7   :  { %132 = shalt.err (!%p129_p2)
}
   0x8   :  { %s133_s15 = scalar_lea.vmem %s15_s7, 128  ;;  %p138_p4 = scmp.lt.s32.totalorder %s15_s7, %s15_s7 }
   0x9   :  { %p134_p3 = scmp.ne.s32.totalorder %s15_s7, %s133_s15  ;;  %p139_p5 = scmp.lt.s32.totalorder %s133_s15, %s133_s15 }
   0xb   :  { %p140_p6 = por %p139_p5, %p138_p4 }
   0xd   :  { %p141_p7 = pnand %p140_p6, %p134_p3 }
   0xf   :  { %144 = shalt.err (!%p141_p7)
}
  0x10   :  { %17 = dma.hbm_to_vmem [thread:$0]  %s256_s0, 128, %s15_s7, [#allocation3]  }
  0x11   :  { %167 = dma.done.wait [#allocation3], 128  }
  0x12   :  { %168 = vsyncadd [#allocation3], 4294967168  ;;  %v22_v0 = vlaneseq  ;;  %v203_v4 = vld [vmem:[#allocation2] sm:$0xff]  ;;  %s172_s18 = smov 1   ;;  %s173_s19 = smov 127  }
  0x13   :  { %s174_s0 = smov 6   ;;  %s175_s20 = smov 3   ;;  %v51_v18 = vmul.f32 -2.0, %v203_v4  ;;  %v50_v20 = vsub.f32 0.0, %v203_v4  ;;  %v58_v49 = vmax.f32 %v203_v4, 0.0 }
  0x14   :  { %v23_v1 = vand.u32 127, %v22_v0  ;;  %s176_s21 = smov 125   ;;  %s177_s22 = smov 122  }
  0x15   :  { %s178_s23 = smov [#allocation5]  }
  0x16   :  { %v24_v2 = vshra.s32 %v23_v1, 3  ;;  %s99_s24 = sshll.u32 %s178_s23, 4  ;;  %s100_s24 = int_to_ptr.vmem [resolvable:$true] %s99_s24 }
  0x17   :  { %s145_s25 = scalar_lea.vmem %s100_s24, 128  ;;  %p150_p9 = scmp.lt.s32.totalorder %s100_s24, %s100_s24 }
  0x18   :  { %v201_v3 = vand.u32 3, %v24_v2  ;;  %p146_p8 = scmp.ne.s32.totalorder %s100_s24, %s145_s25  ;;  %p151_p10 = scmp.lt.s32.totalorder %s145_s25, %s145_s25 }
  0x1a   :  { %vm29_vm0 = vcmp.eq.s32.totalorder %v201_v3, 3  ;;  %vm28_vm1 = vcmp.eq.s32.totalorder %v201_v3, 2  ;;  %vm27_vm2 = vcmp.eq.s32.totalorder %v201_v3, 1  ;;  %vm26_vm3 = vcmp.eq.s32.totalorder %v201_v3, 0  ;;  %p152_p11 = por %p151_p10, %p150_p9 }
  0x1b   :  { %v30_v5 = vsel %vm29_vm0, %v203_v4, -inf }
  0x1c   :  { %31 = vrot.lane.b32.xlu0 %v30_v5, %s172_s18  ;;  %p153_p12 = pnand %p152_p11, %p146_p8 }
  0x20   :  { %34 = vrot.lane.b32.xlu0 %v30_v5, %s173_s19 }
  0x8e   :  { %v32_v6 = vpop.permute.xlu0 %31 }
  0x8f   :  { %v33_v7 = vmax.f32 %v30_v5, %v32_v6 }
  0x92   :  { %v35_v8 = vpop.permute.xlu0 %34 }
  0x93   :  { %v36_v9 = vmax.f32 %v33_v7, %v35_v8 }
  0x95   :  { %43 = vrot.lane.b32.xlu0 %v36_v9, %s174_s0  ;;  %37 = vrot.lane.b32.xlu1 %v36_v9, %s175_s20 }
  0x99   :  { %40 = vrot.lane.b32.xlu1 %v36_v9, %s176_s21 }
  0x9d   :  { %46 = vrot.lane.b32.xlu1 %v36_v9, %s177_s22 }
 0x107   :  { %v38_v10 = vpop.permute.xlu1 %37  ;;  %v44_v14 = vpop.permute.xlu0 %43 }
 0x108   :  { %v39_v11 = vmax.f32 %v36_v9, %v38_v10 }
 0x10b   :  { %v41_v12 = vpop.permute.xlu1 %40 }
 0x10c   :  { %v42_v13 = vmax.f32 %v39_v11, %v41_v12 }
 0x10e   :  { %v45_v15 = vmax.f32 %v42_v13, %v44_v14 }
 0x10f   :  { %v47_v16 = vpop.permute.xlu1 %46 }
 0x110   :  { %v48_v17 = vmax.f32 %v45_v15, %v47_v16 }
 0x112   :  { %v49_v19 = vsel %vm29_vm0, %v48_v17, 0.0 }
 0x113   :  { %v52_v21 = vsub.f32 %v203_v4, %v49_v19 }
 0x115   :  { %v53_v22 = vsel %vm29_vm0, %v52_v21, 0.0 }
 0x116   :  { %v54_v23 = vsel %vm28_vm1, %v51_v18, %v53_v22 }
 0x117   :  { %v55_v24 = vsel %vm27_vm2, %v50_v20, %v54_v23 }
 0x118   :  { %v56_v25 = vmul.f32 1.442695, %v55_v24 }
 0x11a   :  { %117 = vpow2.f32 %v56_v25 }
 0x124   :  { %v118_v26 = vpop.eup %117 }
 0x125   :  { %v64_v27 = vsel %vm29_vm0, %v118_v26, 0.0  ;;  %v59_v38 = vadd.f32 1.0, %v118_v26 }
 0x126   :  { %68 = vrot.lane.b32.xlu1 %v64_v27, %s173_s19  ;;  %65 = vrot.lane.b32.xlu0 %v64_v27, %s172_s18 }
 0x127   :  { %119 = vrcp.f32 %v59_v38 }
 0x131   :  { %v120_v42 = vpop.eup %119 }
 0x132   :  { %v62_v46 = vmul.f32 2.0, %v120_v42 }
 0x134   :  { %v108_v50 = vadd.f32 -1.0, %v62_v46 }
 0x198   :  { %v66_v28 = vpop.permute.xlu0 %65  ;;  %v69_v30 = vpop.permute.xlu1 %68 }
 0x199   :  { %v67_v29 = vadd.f32 %v66_v28, %v64_v27 }
 0x19b   :  { %v70_v31 = vadd.f32 %v69_v30, %v67_v29 }
 0x19d   :  { %74 = vrot.lane.b32.xlu1 %v70_v31, %s176_s21  ;;  %71 = vrot.lane.b32.xlu0 %v70_v31, %s175_s20 }
 0x1a1   :  { %80 = vrot.lane.b32.xlu1 %v70_v31, %s177_s22  ;;  %77 = vrot.lane.b32.xlu0 %v70_v31, %s174_s0 }
 0x20f   :  { %v75_v32 = vpop.permute.xlu1 %74  ;;  %v72_v33 = vpop.permute.xlu0 %71 }
 0x210   :  { %v73_v34 = vadd.f32 %v72_v33, %v70_v31 }
 0x212   :  { %v76_v35 = vadd.f32 %v75_v32, %v73_v34 }
 0x213   :  { %v78_v36 = vpop.permute.xlu0 %77  ;;  %v81_v39 = vpop.permute.xlu1 %80 }
 0x214   :  { %v79_v37 = vadd.f32 %v78_v36, %v76_v35 }
 0x216   :  { %v82_v40 = vadd.f32 %v81_v39, %v79_v37 }
 0x218   :  { %v83_v41 = vsel %vm29_vm0, %v82_v40, 1.0 }
 0x219   :  { %121 = vrcp.f32 %v83_v41 }
 0x223   :  { %v122_v43 = vpop.eup %121 }
 0x224   :  { %v85_v44 = vmul.f32 %v122_v43, %v83_v41 }
 0x226   :  { %v86_v45 = vsub.f32 2.0, %v85_v44 }
 0x228   :  { %v87_v47 = vmul.f32 %v122_v43, %v86_v45 }
 0x22a   :  { %v88_v48 = vmul.f32 %v118_v26, %v87_v47 }
 0x22c   :  { %v89_v51 = vsel %vm28_vm1, %v108_v50, %v88_v48 }
 0x22d   :  { %v90_v52 = vsel %vm27_vm2, %v120_v42, %v89_v51 }
 0x22e   :  { %v91_v53 = vsel %vm26_vm3, %v58_v49, %v90_v52 }
 0x22f   :  { %92 = vst [vmem:[#allocation5] sm:$0xff] %v91_v53 }
 0x230   :  { %156 = shalt.err (!%p153_p12)
}
 0x231   :  { %s157_s28 = scalar_lea.hbm %s257_s1, 128 }
 0x232   :  { %p158_p13 = scmp.ne.s32.totalorder %s257_s1, %s157_s28  ;;  %p161_p0 = scmp.lt.u32.totalorder %s157_s28, %s257_s1 }
 0x234   :  { %p163_p1 = pnand %p161_p0, %p158_p13 }
 0x236   :  { %166 = shalt.err (!%p163_p1)
}
 0x237   :  { %102 = dma.vmem_to_hbm [thread:$0]  %s100_s24, 128, %s257_s1, [#allocation4]  }
 0x238   :  { %169 = dma.done.wait [#allocation4], 128  }
 0x239   :  { %170 = vsyncadd [#allocation4], 4294967168 }
 0x23a   :  { %106 = vsyncpa [#allocation3], 1 }
 0x23b   :  { %107 = vsyncpa [#allocation4], 1 }

</bundles_post_ra>
